<compile_context>
chip_gen: v5e
topology: v5e:2x2
jax: 0.10.0
libtpu: 0.0.40
codegen_flags: <defaults>
</compile_context>

<pallas_src>
import jax
import jax.numpy as jnp
from jax.experimental import pallas as pl
from jax.experimental.pallas import tpu as pltpu

_MIB = 1024 * 1024


def _round_up(a: int, b: int) -> int:
    return (a + b - 1) // b * b


def _device_kind() -> str:
    try:
        return (getattr(jax.devices()[0], "device_kind", "") or "").lower()
    except Exception:
        return ""


def _vmem_capacity_bytes(kind: str) -> int:
    try:
        info = pltpu.get_tpu_info()
        cap = getattr(info, "vmem_capacity_bytes", None)
        if cap:
            return int(cap)
    except Exception:
        pass
    # Fallback from device_kind: v7x has 64 MiB per TensorCore, v5e/v6e have 128 MiB.
    if "7" in kind:
        return 64 * _MIB
    return 128 * _MIB


def _stream_tm_target(kind: str) -> int:
    # Arithmetic intensity of the I-streamed loop is ~tm flops per weight byte; pick tm
    # above each generation's HBM roofline crossover (v6e ~650, v7x ~310, v5e ~240).
    if "v6" in kind:
        return 1024
    if "7" in kind:
        return 512
    if "v5" in kind:
        return 512
    return 768


def _gelu_exact(h):
    # exact (erf-based) GELU, matching torch.nn.functional.gelu default.
    # erf runs on the EUP slot, which is free while the MXU is busy.
    return 0.5 * h * (1.0 + jax.lax.erf(h * 0.7071067811865476))


def _ffn_kernel_resident(x_ref, w1_ref, b1_ref, w2_ref, b2_ref, o_ref):
    # x_ref: (tm, H)   w1_ref: (H, I)   b1_ref: (1, I)
    # w2_ref: (I, H)   b2_ref: (1, H)   o_ref: (tm, H)
    # Weights are VMEM-resident (constant block index); no reduction axis needed.
    h = jnp.dot(x_ref[...], w1_ref[...], preferred_element_type=jnp.float32)
    h = _gelu_exact(h + b1_ref[...].astype(jnp.float32))
    # TODO(synk): dropout implemented as identity (inference mode); training-mode RNG
    # mask (pltpu.prng_*) is intentionally omitted.
    out = jnp.dot(h.astype(w2_ref.dtype), w2_ref[...],
                  preferred_element_type=jnp.float32)
    o_ref[...] = (out + b2_ref[...].astype(jnp.float32)).astype(o_ref.dtype)


def _ffn_kernel_streamed(x_ref, w1_ref, b1_ref, w2_ref, b2_ref, o_ref, acc_ref):
    # x_ref: (tm, H)    w1_ref: (H, tni)   b1_ref: (1, tni)
    # w2_ref: (tni, H)  b2_ref: (1, H)     o_ref: (tm, H)
    # acc_ref: (tm, H) f32 scratch, resident across the I-reduction axis.
    j = pl.program_id(1)
    nj = pl.num_programs(1)

    @pl.when(j == 0)
    def _init():
        acc_ref[...] = jnp.zeros_like(acc_ref)

    # fc1 chunk: native-dtype operands, f32 accumulation on the MXU.
    h = jnp.dot(x_ref[...], w1_ref[...], preferred_element_type=jnp.float32)
    h = _gelu_exact(h + b1_ref[...].astype(jnp.float32))
    # TODO(synk): dropout implemented as identity (inference mode).

    # fc2 partial product for this I-chunk (bf16 MXU path when weights are bf16).
    partial = jnp.dot(h.astype(w2_ref.dtype), w2_ref[...],
                      preferred_element_type=jnp.float32)

    @pl.when(j < nj - 1)
    def _accum():
        acc_ref[...] += partial

    # Finalize folded into the last reduction step: saves one (tm, H) f32 VMEM
    # store + reload per M tile.
    @pl.when(j == nj - 1)
    def _finalize():
        o_ref[...] = (acc_ref[...] + partial
                      + b2_ref[...].astype(jnp.float32)).astype(o_ref.dtype)


def feed_forward(x, w1, b1, w2, b2, *, tm=None, tni=None,
                 vmem_limit_bytes=None, cast_operands_to_bf16=False):
    """BERT FeedForward forward pass (dropout = identity / inference mode).

    x:  [B, S, H]
    w1: [H, I]   (torch fc1.weight transposed)   b1: [I]
    w2: [I, H]   (torch fc2.weight transposed)   b2: [H]
    returns [B, S, H] in x.dtype
    """
    B, S, H = x.shape
    I = w1.shape[1]
    assert w1.shape == (H, I) and w2.shape == (I, H)
    assert b1.shape == (I,) and b2.shape == (H,)
    M = B * S

    out_dtype = x.dtype
    if cast_operands_to_bf16:
        x = x.astype(jnp.bfloat16)
        w1 = w1.astype(jnp.bfloat16)
        w2 = w2.astype(jnp.bfloat16)

    kind = _device_kind()
    vmem_cap = _vmem_capacity_bytes(kind)
    # Never hand the whole physical VMEM to the kernel (v7x: 64 MiB total per TC);
    # leave ~12 MiB headroom for compiler scratch.
    budget = max(32 * _MIB, vmem_cap - 12 * _MIB)
    if vmem_limit_bytes is None:
        vmem_limit_bytes = budget
    else:
        budget = min(budget, int(vmem_limit_bytes))

    db_w = w1.dtype.itemsize
    db_x = x.dtype.itemsize
    db_o = jnp.dtype(out_dtype).itemsize
    weight_bytes = 2 * H * I * db_w

    def resident_bytes(tm_, wbuf):
        # resident weights (+biases), double-buffered x/out tiles, f32 GELU intermediate
        # (+ its cast copy feeding fc2), plus slack for compiler temporaries.
        return (weight_bytes * wbuf + 2 * (I + H) * db_w
                + 2 * tm_ * H * (db_x + db_o)
                + tm_ * I * (4 + db_w) + 4 * _MIB)

    def streamed_bytes(tm_, tni_):
        return (2 * 2 * H * tni_ * db_w + 2 * (tni_ + H) * db_w
                + 2 * tm_ * H * (db_x + db_o)
                + tm_ * H * 4
                + tm_ * tni_ * (4 + db_w) + 4 * _MIB)

    # ---- weight-resident vs I-streamed path decision -----------------------------------
    user_forced_stream = (tni is not None) and (tni < I)
    resident = False
    single_buffer_weights = False
    if not user_forced_stream:
        tm_probe = tm if tm is not None else max(8, min(512, _round_up(min(M, 512), 8)))
        if resident_bytes(tm_probe, 2) <= budget:
            resident = True
        elif resident_bytes(tm_probe, 1) <= budget:
            # Single-buffer the constant-index weight blocks so they fit (v7x bf16 case).
            resident, single_buffer_weights = True, True

    # ---- intermediate (I) tiling when streaming -----------------------------------------
    if resident:
        tni = I
    elif tni is None:
        tni = I
        for cand in (1024, 512, 256, 128):
            if I > cand and I % cand == 0:
                tni = cand
                break
    assert I % tni == 0, "tni must divide the intermediate size"
    assert tni == I or tni % 128 == 0, "tni must be a multiple of 128 (or the full I)"

    # ---- row (M) tiling ------------------------------------------------------------------
    if tm is None:
        target = 512 if resident else _stream_tm_target(kind)
        target = max(8, min(_round_up(target, 8), _round_up(M, 8)))
        if M <= target:
            tm = _round_up(M, 8)
        else:
            # Prefer a divisor of M (multiple of 8) so no host-side pad of x is needed.
            tm = 0
            if M % 8 == 0:
                for cand in range(target, 7, -8):
                    if M % cand == 0:
                        tm = cand
                        break
            if tm < min(target, 128):
                tm = target  # no good divisor: fall back to padding the M tail.
        if not resident:
            # Shrink tm until the streamed working set fits the VMEM budget.
            while tm > 128 and streamed_bytes(tm, tni) > budget:
                tm = _round_up(tm // 2, 8)
        # Aim for >= 2 row tiles so the "parallel" M axis can shard across the two
        # TensorCores of a v7x chip (sequential but ~free on single-TC parts).
        if M >= 128 and _round_up(M, tm) // tm < 2:
            tm = _round_up((M + 1) // 2, 8)
    assert tm % 8 == 0, "tm must be a multiple of 8"
    M_pad = _round_up(M, tm)

    x2d = x.reshape(M, H)
    if M_pad != M:
        # Fallback only: tm selection above avoids this whenever M has a usable divisor.
        x2d = jnp.pad(x2d, ((0, M_pad - M), (0, 0)))
    b1_2d = b1.reshape(1, I)
    b2_2d = b2.reshape(1, H)

    if resident:
        grid = (M_pad // tm,)
        w_kwargs = {}
        if single_buffer_weights:
            # Constant-index weights are DMA'd once; don't double-buffer them in VMEM.
            w_kwargs = dict(pipeline_mode=pl.Buffered(1))
        in_specs = [
            pl.BlockSpec((tm, H), lambda i: (i, 0)),            # x rows
            pl.BlockSpec((H, I), lambda i: (0, 0), **w_kwargs),  # W1 resident
            pl.BlockSpec((1, I), lambda i: (0, 0)),             # b1
            pl.BlockSpec((I, H), lambda i: (0, 0), **w_kwargs),  # W2 resident
            pl.BlockSpec((1, H), lambda i: (0, 0)),             # b2
        ]
        out_specs = pl.BlockSpec((tm, H), lambda i: (i, 0))
        kernel = _ffn_kernel_resident
        scratch_shapes = []
        dimension_semantics = ("parallel",)
    else:
        grid = (M_pad // tm, I // tni)
        in_specs = [
            pl.BlockSpec((tm, H), lambda i, j: (i, 0)),    # x rows (constant over j)
            pl.BlockSpec((H, tni), lambda i, j: (0, j)),   # W1 chunk (streams over I)
            pl.BlockSpec((1, tni), lambda i, j: (0, j)),   # b1 chunk
            pl.BlockSpec((tni, H), lambda i, j: (j, 0)),   # W2 chunk (streams over I)
            pl.BlockSpec((1, H), lambda i, j: (0, 0)),     # b2
        ]
        out_specs = pl.BlockSpec((tm, H), lambda i, j: (i, 0))
        kernel = _ffn_kernel_streamed
        scratch_shapes = [pltpu.VMEM((tm, H), jnp.float32)]  # fc2 accumulator
        dimension_semantics = ("parallel", "arbitrary")

    out2d = pl.pallas_call(
        kernel,
        out_shape=jax.ShapeDtypeStruct((M_pad, H), out_dtype),
        grid_spec=pltpu.PrefetchScalarGridSpec(
            num_scalar_prefetch=0,
            grid=grid,
            in_specs=in_specs,
            out_specs=out_specs,
            scratch_shapes=scratch_shapes,
        ),
        compiler_params=pltpu.CompilerParams(
            dimension_semantics=dimension_semantics,
            vmem_limit_bytes=int(vmem_limit_bytes),
        ),
    )(x2d, w1, b1_2d, w2, b2_2d)

    if M_pad != M:
        out2d = out2d[:M]
    return out2d.reshape(B, S, H)


def _reference(x, w1, b1, w2, b2):
    h = jnp.dot(x, w1) + b1
    h = jax.nn.gelu(h, approximate=False)
    return jnp.dot(h, w2) + b2


if __name__ == "__main__":
    def make_params(key, H, I, dtype):
        k1, k2, k3, k4 = jax.random.split(key, 4)
        w1 = (jax.random.normal(k1, (H, I), dtype=jnp.float32) * 0.02).astype(dtype)
        b1 = (jax.random.normal(k2, (I,), dtype=jnp.float32) * 0.02).astype(dtype)
        w2 = (jax.random.normal(k3, (I, H), dtype=jnp.float32) * 0.02).astype(dtype)
        b2 = (jax.random.normal(k4, (H,), dtype=jnp.float32) * 0.02).astype(dtype)
        return w1, b1, w2, b2

    # Case 1: toy BERT config (hidden=32 -> intermediate=128), batch=2, seq=8.
    # Hits the weight-resident path with a single M tile.
    B, S, H = 2, 8, 32
    I = 4 * H
    kx, kp = jax.random.split(jax.random.PRNGKey(0))
    x = jax.random.normal(kx, (B, S, H), dtype=jnp.float32)
    w1, b1, w2, b2 = make_params(kp, H, I, jnp.float32)
    out = jax.block_until_ready(feed_forward(x, w1, b1, w2, b2))
    ref = _reference(x, w1, b1, w2, b2)
    assert out.shape == (B, S, H)
    assert jnp.allclose(out, ref, atol=2e-3, rtol=2e-2), "case 1 mismatch vs reference"

    # Case 2: user-forced streamed-I path with an explicit tm that pads M (120 -> 128),
    # exercising the f32 VMEM accumulator and the folded finalize.
    B, S, H = 3, 40, 64
    I = 4 * H
    kx, kp = jax.random.split(jax.random.PRNGKey(1))
    x = jax.random.normal(kx, (B, S, H), dtype=jnp.float32)
    w1, b1, w2, b2 = make_params(kp, H, I, jnp.float32)
    out = jax.block_until_ready(feed_forward(x, w1, b1, w2, b2, tm=32, tni=128))
    ref = _reference(x, w1, b1, w2, b2)
    assert jnp.allclose(out, ref, atol=2e-3, rtol=2e-2), "case 2 mismatch vs reference"

    # Case 3: bf16 inputs/weights, auto config -> weight-resident, multi M-tile grid,
    # bf16-in / f32-accumulate MXU path (no upcasts).
    B, S, H = 2, 64, 128
    I = 4 * H
    kx, kp = jax.random.split(jax.random.PRNGKey(2))
    x = jax.random.normal(kx, (B, S, H), dtype=jnp.float32).astype(jnp.bfloat16)
    w1, b1, w2, b2 = make_params(kp, H, I, jnp.bfloat16)
    out = jax.block_until_ready(feed_forward(x, w1, b1, w2, b2))
    ref = _reference(x.astype(jnp.float32), w1.astype(jnp.float32),
                     b1.astype(jnp.float32), w2.astype(jnp.float32),
                     b2.astype(jnp.float32))
    assert jnp.allclose(out.astype(jnp.float32), ref, atol=2e-2, rtol=2e-1), \
        "case 3 (bf16) mismatch vs reference"

    # Case 4: larger f32 case, auto config -> weight-resident with >= 2 parallel M tiles
    # (megacore-friendly) and no host-side padding (tm divides M).
    B, S, H = 4, 128, 256
    I = 4 * H
    kx, kp = jax.random.split(jax.random.PRNGKey(3))
    x = jax.random.normal(kx, (B, S, H), dtype=jnp.float32)
    w1, b1, w2, b2 = make_params(kp, H, I, jnp.float32)
    out = jax.block_until_ready(feed_forward(x, w1, b1, w2, b2))
    ref = _reference(x, w1, b1, w2, b2)
    assert jnp.allclose(out, ref, atol=2e-3, rtol=2e-2), "case 4 mismatch vs reference"

    print("KERNEL_OK")
</pallas_src>

<mosaic_0001>
module attributes {stable_mosaic.version = 11 : i64} {
  func.func @_ffn_kernel_resident(%arg0: i32, %arg1: memref<16x32xf32, #tpu.memory_space<vmem>>, %arg2: memref<32x128xf32, #tpu.memory_space<vmem>>, %arg3: memref<1x128xf32, #tpu.memory_space<vmem>>, %arg4: memref<128x32xf32, #tpu.memory_space<vmem>>, %arg5: memref<1x32xf32, #tpu.memory_space<vmem>>, %arg6: memref<16x32xf32, #tpu.memory_space<vmem>>) attributes {dimension_semantics = [#tpu.dimension_semantics<parallel>], iteration_bounds = array<i64: 1>, scalar_prefetch = 0 : i64, scratch_operands = 0 : i64, tpu.core_type = #tpu.core_type<tc>, window_params = [{transform_indices = @transform_0, window_bounds = array<i64: 16, 32>}, {pipeline_mode = #tpu.pipeline_mode<synchronous>, transform_indices = @transform_1, window_bounds = array<i64: 32, 128>}, {pipeline_mode = #tpu.pipeline_mode<synchronous>, transform_indices = @transform_2, window_bounds = array<i64: 1, 128>}, {pipeline_mode = #tpu.pipeline_mode<synchronous>, transform_indices = @transform_3, window_bounds = array<i64: 128, 32>}, {pipeline_mode = #tpu.pipeline_mode<synchronous>, transform_indices = @transform_4, window_bounds = array<i64: 1, 32>}, {transform_indices = @transform_5, window_bounds = array<i64: 16, 32>}]} {
    %c0 = arith.constant 0 : index
    %c0_0 = arith.constant 0 : index
    %0 = vector.load %arg1[%c0, %c0_0] : memref<16x32xf32, #tpu.memory_space<vmem>>, vector<16x32xf32>
    %c0_1 = arith.constant 0 : index
    %c0_2 = arith.constant 0 : index
    %1 = vector.load %arg2[%c0_1, %c0_2] : memref<32x128xf32, #tpu.memory_space<vmem>>, vector<32x128xf32>
    %cst = arith.constant dense<0.000000e+00> : vector<16x128xf32>
    %2 = tpu.matmul %0, %1, %cst {dimension_numbers = #tpu.dot_dimension_numbers<[1], [0], [0], [1], [0, 0, 1, 1], [], []>} : vector<16x32xf32>, vector<32x128xf32>, vector<16x128xf32> -> vector<16x128xf32>
    %c0_3 = arith.constant 0 : index
    %c0_4 = arith.constant 0 : index
    %3 = vector.load %arg3[%c0_3, %c0_4] : memref<1x128xf32, #tpu.memory_space<vmem>>, vector<1x128xf32>
    %4 = vector.broadcast %3 : vector<1x128xf32> to vector<16x128xf32>
    %5 = arith.addf %2, %4 : vector<16x128xf32>
    %cst_5 = arith.constant 5.000000e-01 : f32
    %6 = vector.broadcast %cst_5 : f32 to vector<16x128xf32>
    %7 = arith.mulf %6, %5 : vector<16x128xf32>
    %cst_6 = arith.constant 0.707106769 : f32
    %8 = vector.broadcast %cst_6 : f32 to vector<16x128xf32>
    %9 = arith.mulf %5, %8 : vector<16x128xf32>
    %10 = math.erf %9 : vector<16x128xf32>
    %cst_7 = arith.constant 1.000000e+00 : f32
    %11 = vector.broadcast %cst_7 : f32 to vector<16x128xf32>
    %12 = arith.addf %11, %10 : vector<16x128xf32>
    %13 = arith.mulf %7, %12 : vector<16x128xf32>
    %c0_8 = arith.constant 0 : index
    %c0_9 = arith.constant 0 : index
    %14 = vector.load %arg4[%c0_8, %c0_9] : memref<128x32xf32, #tpu.memory_space<vmem>>, vector<128x32xf32>
    %cst_10 = arith.constant dense<0.000000e+00> : vector<16x32xf32>
    %15 = tpu.matmul %13, %14, %cst_10 {dimension_numbers = #tpu.dot_dimension_numbers<[1], [0], [0], [1], [0, 0, 1, 1], [], []>} : vector<16x128xf32>, vector<128x32xf32>, vector<16x32xf32> -> vector<16x32xf32>
    %c0_11 = arith.constant 0 : index
    %c0_12 = arith.constant 0 : index
    %16 = vector.load %arg5[%c0_11, %c0_12] : memref<1x32xf32, #tpu.memory_space<vmem>>, vector<1x32xf32>
    %17 = vector.broadcast %16 : vector<1x32xf32> to vector<16x32xf32>
    %18 = arith.addf %15, %17 : vector<16x32xf32>
    %c0_13 = arith.constant 0 : index
    %c0_14 = arith.constant 0 : index
    %19 = vector.load %arg6[%c0_13, %c0_14] : memref<16x32xf32, #tpu.memory_space<vmem>>, vector<16x32xf32>
    tpu.vector_store %arg6[%c0_13, %c0_14], %18 {strides = array<i32>} : memref<16x32xf32, #tpu.memory_space<vmem>>, vector<16x32xf32>,
    return
  }
  func.func @transform_0(%arg0: i32) -> (i32, i32) {
    %c0_i32 = arith.constant 0 : i32
    %c0_i32_0 = arith.constant 0 : i32
    return %arg0, %c0_i32 : i32, i32
  }
  func.func @transform_1(%arg0: i32) -> (i32, i32) {
    %c0_i32 = arith.constant 0 : i32
    %c0_i32_0 = arith.constant 0 : i32
    %c0_i32_1 = arith.constant 0 : i32
    return %c0_i32, %c0_i32_0 : i32, i32
  }
  func.func @transform_2(%arg0: i32) -> (i32, i32) {
    %c0_i32 = arith.constant 0 : i32
    %c0_i32_0 = arith.constant 0 : i32
    %c0_i32_1 = arith.constant 0 : i32
    return %c0_i32, %c0_i32_0 : i32, i32
  }
  func.func @transform_3(%arg0: i32) -> (i32, i32) {
    %c0_i32 = arith.constant 0 : i32
    %c0_i32_0 = arith.constant 0 : i32
    %c0_i32_1 = arith.constant 0 : i32
    return %c0_i32, %c0_i32_0 : i32, i32
  }
  func.func @transform_4(%arg0: i32) -> (i32, i32) {
    %c0_i32 = arith.constant 0 : i32
    %c0_i32_0 = arith.constant 0 : i32
    %c0_i32_1 = arith.constant 0 : i32
    return %c0_i32, %c0_i32_0 : i32, i32
  }
  func.func @transform_5(%arg0: i32) -> (i32, i32) {
    %c0_i32 = arith.constant 0 : i32
    %c0_i32_0 = arith.constant 0 : i32
    return %arg0, %c0_i32 : i32, i32
  }
}

</mosaic_0001>

<bundles_post_ra>
// kernel: tpu_custom_call.1
= control target key start
LH: loop header
LB: loop body
LE: loop exit
PB: predicated region body
PF: predicated region fallthrough
CT: control target
= control target key end

     0   :  { %s409_s0 = inlined_call_operand.vmem [shape: f32[16,32], index: 0, kind: input, shape index: {}]   ;;  %s410_s1 = inlined_call_operand.vmem [shape: f32[32,128], index: 1, kind: input, shape index: {}]   ;;  %s411_s2 = inlined_call_operand.vmem [shape: f32[1,128], index: 2, kind: input, shape index: {}]   ;;  %s412_s3 = inlined_call_operand.vmem [shape: f32[128,32], index: 3, kind: input, shape index: {}]   ;;  %s413_s4 = inlined_call_operand.vmem [shape: f32[1,32], index: 4, kind: input, shape index: {}]   ;;  %s414_s5 = inlined_call_operand.hbm [shape: f32[16,32], index: 5, kind: output, shape index: {}]  }
   0x1   :  { %v26_v0 = vld [vmem:[%s410_s1 + $0x18] sm:$0xff]  ;;  %v25_v1 = vld [vmem:[%s410_s1 + $0x10] sm:$0xff]  ;;  %v24_v2 = vld [vmem:[%s410_s1 + $0x8] sm:$0xff] }
   0x2   :  { %50 = vmatpush.msra.mxu0 %v26_v0 }
   0x4   :  { %51 = vmatpush.msra.mxu0 %v25_v1 }
   0x5   :  { %10 = vsyncpa [#allocation3], 0  ;;  %v23_v3 = vld [vmem:[%s410_s1] sm:$0xff]  ;;  %vm31_vm0 = vcmask 261120   ;;  %v22_v5 = vld [vmem:[%s409_s0 + $0x8] sm:$0xff]  ;;  %s267_s10 = smov [#allocation2]  }
   0x6   :  { %52 = vmatpush.msra.mxu0 %v24_v2  ;;  %v21_v4 = vld [vmem:[%s409_s0] sm:$0xff]  ;;  %v164_v6 = vld [vmem:[%s412_s3 + $0x78] sm:$0xff]  ;;  %v163_v7 = vld [vmem:[%s412_s3 + $0x70] sm:$0xff]  ;;  %s198_s11 = sshll.u32 %s267_s10, 4  ;;  %s200_s14 = sshll.u32 %s414_s5, 4  ;;  %s199_s11 = int_to_ptr.vmem [resolvable:$true] %s198_s11  ;;  %s201_s14 = int_to_ptr.hbm [resolvable:$true] %s200_s14 }
   0x7   :  { %169 = vmatpush.msra.mxu1 %v164_v6  ;;  %216 = vmatpush.msra.mxu2 %v164_v6  ;;  %v162_v8 = vld [vmem:[%s412_s3 + $0x68] sm:$0xff]  ;;  %v161_v9 = vld [vmem:[%s412_s3 + $0x60] sm:$0xff]  ;;  %v160_v11 = vld [vmem:[%s412_s3 + $0x58] sm:$0xff]  ;;  %s268_s15 = smov 128   ;;  %s269_s16 = smov 8  }
   0x8   :  { %53 = vmatpush.msra.mxu0 %v23_v3  ;;  %v235_v10 = vld [vmem:[%s411_s2] ss:$0 sm:$0xff]  ;;  %v159_v13 = vld [vmem:[%s412_s3 + $0x50] sm:$0xff]  ;;  %v158_v15 = vld [vmem:[%s412_s3 + $0x48] sm:$0xff] }
   0x9   :  { %212 = vmatmul.msk.f32.vlgmr.msra.gmra.mxu0 %vm31_vm0, %v21_v4  ;;  %170 = vmatpush.msra.mxu1 %v163_v7  ;;  %v157_v17 = vld [vmem:[%s412_s3 + $0x40] sm:$0xff]  ;;  %v156_v19 = vld [vmem:[%s412_s3 + $0x38] sm:$0xff]  ;;  %v155_v20 = vld [vmem:[%s412_s3 + $0x30] sm:$0xff] }
   0xa   :  { %217 = vmatpush.msra.mxu2 %v163_v7  ;;  %v154_v23 = vld [vmem:[%s412_s3 + $0x28] sm:$0xff]  ;;  %v153_v27 = vld [vmem:[%s412_s3 + $0x20] sm:$0xff]  ;;  %v152_v30 = vld [vmem:[%s412_s3 + $0x18] sm:$0xff] }
   0xb   :  { %171 = vmatpush.msra.mxu1 %v162_v8  ;;  %v151_v34 = vld [vmem:[%s412_s3 + $0x10] sm:$0xff]  ;;  %v150_v37 = vld [vmem:[%s412_s3 + $0x8] sm:$0xff]  ;;  %v149_v42 = vld [vmem:[%s412_s3] sm:$0xff] }
   0xc   :  { %218 = vmatpush.msra.mxu2 %v162_v8 }
   0xd   :  { %172 = vmatpush.msra.mxu1 %v161_v9 }
   0xe   :  { %219 = vmatpush.msra.mxu2 %v161_v9 }
   0xf   :  { %173 = vmatpush.msra.mxu1 %v160_v11 }
  0x10   :  { %220 = vmatpush.msra.mxu2 %v160_v11 }
  0x11   :  { %213 = vmatmul.msk.f32.gmra.mxu0 %vm31_vm0, %v22_v5  ;;  %174 = vmatpush.msra.mxu1 %v159_v13 }
  0x12   :  { %221 = vmatpush.msra.mxu2 %v159_v13 }
  0x13   :  { %175 = vmatpush.msra.mxu1 %v158_v15 }
  0x14   :  { %222 = vmatpush.msra.mxu2 %v158_v15 }
  0x15   :  { %176 = vmatpush.msra.mxu1 %v157_v17 }
  0x16   :  { %223 = vmatpush.msra.mxu2 %v157_v17 }
  0x17   :  { %177 = vmatpush.msra.mxu1 %v156_v19 }
  0x18   :  { %224 = vmatpush.msra.mxu2 %v156_v19 }
  0x19   :  { %178 = vmatpush.msra.mxu1 %v155_v20 }
  0x1a   :  { %225 = vmatpush.msra.mxu2 %v155_v20 }
  0x1b   :  { %179 = vmatpush.msra.mxu1 %v154_v23 }
  0x1c   :  { %226 = vmatpush.msra.mxu2 %v154_v23 }
  0x1d   :  { %180 = vmatpush.msra.mxu1 %v153_v27 }
  0x1e   :  { %227 = vmatpush.msra.mxu2 %v153_v27 }
  0x1f   :  { %181 = vmatpush.msra.mxu1 %v152_v30 }
  0x20   :  { %228 = vmatpush.msra.mxu2 %v152_v30 }
  0x21   :  { %182 = vmatpush.msra.mxu1 %v151_v34 }
  0x22   :  { %229 = vmatpush.msra.mxu2 %v151_v34 }
  0x23   :  { %183 = vmatpush.msra.mxu1 %v150_v37 }
  0x24   :  { %230 = vmatpush.msra.mxu2 %v150_v37 }
  0x25   :  { %184 = vmatpush.msra.mxu1 %v149_v42 }
  0x26   :  { %231 = vmatpush.msra.mxu2 %v149_v42 }
  0x86   :  { %v55_v12 = vpop.f32.mrf.mxu0 }
  0x87   :  { %v341_v14 = vadd.f32 %v235_v10, %v55_v12 }
  0x89   :  { %v347_v16 = vmul.f32 0.70710677, %v341_v14 }
  0x8b   :  { %v65_v18 = vmul.f32 %v347_v16, %v347_v16 }
  0x8d   :  { %v360_v21 = vmin.f32 %v65_v18, 16.0 }
  0x8e   :  { %v58_v22 = vpop.f32.mrf.mxu0 }
  0x8f   :  { %v67_v24 = vmul.f32 2.1237322e-06, %v360_v21  ;;  %v366_v25 = vadd.f32 %v235_v10, %v58_v22  ;;  %v78_v26 = vmul.f32 3.8918573e-05, %v360_v21 }
  0x91   :  { %v68_v28 = vadd.f32 0.00028619796, %v67_v24  ;;  %v373_v29 = vmul.f32 0.70710677, %v366_v25  ;;  %v79_v31 = vadd.f32 0.001143296, %v78_v26 }
  0x93   :  { %v69_v32 = vmul.f32 %v68_v28, %v360_v21  ;;  %v105_v33 = vmul.f32 %v373_v29, %v373_v29  ;;  %v80_v35 = vmul.f32 %v79_v31, %v360_v21 }
  0x95   :  { %v106_v36 = vmin.f32 %v105_v33, 16.0  ;;  %v81_v38 = vadd.f32 0.014752088, %v80_v35  ;;  %v70_v39 = vadd.f32 0.0036580483, %v69_v32  ;;  %v61_v33 = vmul.f32 0.5, %v341_v14 }
  0x96   :  { %v236_v14 = vld [vmem:[%s413_s4] ss:$0 sm:$0xff] }
  0x97   :  { %v107_v40 = vmul.f32 2.1237322e-06, %v106_v36  ;;  %v118_v41 = vmul.f32 3.8918573e-05, %v106_v36  ;;  %v82_v43 = vmul.f32 %v81_v38, %v360_v21  ;;  %v71_v47 = vmul.f32 %v70_v39, %v360_v21 }
  0x99   :  { %v108_v44 = vadd.f32 0.00028619796, %v107_v40  ;;  %v119_v45 = vadd.f32 0.001143296, %v118_v41  ;;  %v83_v46 = vadd.f32 0.112945676, %v82_v43 }
  0x9a   :  { %v72_v54 = vadd.f32 0.05243302, %v71_v47  ;;  %v62_v41 = vmul.f32 0.5, %v366_v25 }
  0x9b   :  { %v109_v48 = vmul.f32 %v108_v44, %v106_v36  ;;  %v120_v49 = vmul.f32 %v119_v45, %v106_v36  ;;  %v84_v50 = vmul.f32 %v83_v46, %v360_v21 }
  0x9c   :  { %v73_v60 = vmul.f32 %v72_v54, %v360_v21 }
  0x9d   :  { %v121_v51 = vadd.f32 0.014752088, %v120_v49  ;;  %v110_v52 = vadd.f32 0.0036580483, %v109_v48  ;;  %v85_v53 = vadd.f32 0.4994258, %v84_v50 }
  0x9e   :  { %v74_v0 = vadd.f32 0.18741608, %v73_v60 }
  0x9f   :  { %v122_v55 = vmul.f32 %v121_v51, %v106_v36  ;;  %v86_v56 = vmul.f32 %v85_v53, %v360_v21  ;;  %v111_v58 = vmul.f32 %v110_v52, %v106_v36 }
  0xa0   :  { %v75_v5 = vmul.f32 %v74_v0, %v360_v21 }
  0xa1   :  { %v123_v57 = vadd.f32 0.112945676, %v122_v55  ;;  %v87_v59 = vadd.f32 1.0, %v86_v56  ;;  %v112_v63 = vadd.f32 0.05243302, %v111_v58 }
  0xa2   :  { %v76_v10 = vadd.f32 1.1283791, %v75_v5 }
  0xa3   :  { %v124_v61 = vmul.f32 %v123_v57, %v106_v36  ;;  %237 = vrcp.f32 %v87_v59  ;;  %v113_v4 = vmul.f32 %v112_v63, %v106_v36  ;;  %v99_v9 = vand.u32 2147483648, %v87_v59 }
  0xa4   :  { %v97_v12 = vand.u32 2147483647, %v87_v59  ;;  %vm93_vm2 = vweird.f32 %v87_v59  ;;  %v77_v20 = vmul.f32 %v76_v10, %v347_v16 }
  0xa5   :  { %v125_v62 = vadd.f32 0.4994258, %v124_v61  ;;  %v114_v8 = vadd.f32 0.18741608, %v113_v4  ;;  %v100_v18 = vor.u32 1.1754944e-38, %v99_v9 }
  0xa6   :  { %vm98_vm4 = vcmp.eq.f32.partialorder %v97_v12, 8.507059e+37 }
  0xa7   :  { %v126_v1 = vmul.f32 %v125_v62, %v106_v36  ;;  %v115_v17 = vmul.f32 %v114_v8, %v106_v36 }
  0xa9   :  { %v127_v2 = vadd.f32 1.0, %v126_v1  ;;  %v238_v3 = vpop.eup %237  ;;  %v116_v27 = vadd.f32 1.1283791, %v115_v17 }
  0xaa   :  { %v89_v6 = vmul.f32 %v238_v3, %v87_v59  ;;  %vm94_vm1 = vweird.f32 %v238_v3 }
  0xab   :  { %239 = vrcp.f32 %v127_v2  ;;  %vm95_vm3 = vmor %vm93_vm2, %vm94_vm1  ;;  %v139_v26 = vand.u32 2147483648, %v127_v2  ;;  %v137_v30 = vand.u32 2147483647, %v127_v2  ;;  %vm133_vm6 = vweird.f32 %v127_v2 }
  0xac   :  { %v90_v7 = vsub.f32 1.0, %v89_v6  ;;  %v117_v16 = vmul.f32 %v116_v27, %v373_v29 }
  0xad   :  { %v140_v35 = vor.u32 1.1754944e-38, %v139_v26  ;;  %vm138_vm8 = vcmp.eq.f32.partialorder %v137_v30, 8.507059e+37 }
  0xae   :  { %v91_v11 = vmul.f32 %v238_v3, %v90_v7 }
  0xb0   :  { %v92_v15 = vadd.f32 %v238_v3, %v91_v11 }
  0xb1   :  { %v240_v13 = vpop.eup %239 }
  0xb2   :  { %v129_v19 = vmul.f32 %v240_v13, %v127_v2  ;;  %v96_v22 = vsel %vm95_vm3, %v238_v3, %v92_v15  ;;  %vm134_vm5 = vweird.f32 %v240_v13 }
  0xb3   :  { %v101_v21 = vsel %vm98_vm4, %v100_v18, %v96_v22  ;;  %vm135_vm7 = vmor %vm133_vm6, %vm134_vm5 }
  0xb4   :  { %v130_v23 = vsub.f32 1.0, %v129_v19  ;;  %v102_v24 = vmul.f32 %v101_v21, %v77_v20 }
  0xb6   :  { %v131_v28 = vmul.f32 %v240_v13, %v130_v23  ;;  %v214_v31 = vclamps-f32 %v102_v24, 1.0 }
  0xb8   :  { %v132_v32 = vadd.f32 %v240_v13, %v131_v28  ;;  %v145_v34 = vadd.f32 1.0, %v214_v31 }
  0xba   :  { %v136_v36 = vsel %vm135_vm7, %v240_v13, %v132_v32  ;;  %v147_v37 = vmul.f32 %v145_v34, %v61_v33 }
  0xbb   :  { %v141_v38 = vsel %vm138_vm8, %v140_v35, %v136_v36 }
  0xbc   :  { %v142_v39 = vmul.f32 %v141_v38, %v117_v16  ;;  %185 = vmatmul.f32.vlgmr.msra.gmra.mxu1 %v147_v37 }
  0xbe   :  { %v215_v40 = vclamps-f32 %v142_v39, 1.0 }
  0xc0   :  { %v146_v42 = vadd.f32 1.0, %v215_v40 }
  0xc2   :  { %v148_v43 = vmul.f32 %v146_v42, %v62_v41 }
  0xc4   :  { %188 = vmatmul.f32.vlgmr.msra.gmra.mxu2 %v148_v43 }
 0x139   :  { %v186_v44 = vpop.f32.mrf.mxu1 }
 0x13a   :  { %v187_v45 = vadd.f32 %v236_v14, %v186_v44 }
 0x13c   :  { %192 = vst.msk [vmem:[#allocation2] sm:$0xff] %vm31_vm0, %v187_v45 }
 0x147   :  { %v189_v29 = vpop.f32.mrf.mxu2 }
 0x148   :  { %v190_v25 = vadd.f32 %v236_v14, %v189_v29 }
 0x14a   :  { %193 = vst.msk [vmem:[#allocation2 + $0x8] sm:$0xff] %vm31_vm0, %v190_v25 }
 0x14b   :  { %206 = dma.vmem_to_hbm [thread:$0]  %s199_s11, 256, %s201_s14, [#allocation3], %s268_s15, %s268_s15, %s269_s16  }
 0x14c   :  { %265 = dma.done.wait [#allocation3], 256  }
 0x14d   :  { %266 = vsyncadd [#allocation3], 4294967040 }
 0x14e   :  { %211 = vsyncpa [#allocation3], 1 }

</bundles_post_ra>
